<compile_context>
chip_gen: v7x
topology: tpu7x:2x2x1
jax: 0.10.0
libtpu: 0.0.40
codegen_flags: <defaults>
</compile_context>

<pallas_src>
import functools

import jax
import jax.numpy as jnp
from jax.experimental import pallas as pl
from jax.experimental.pallas import tpu as pltpu

LANES = 128  # TPU lane width; every packed slab is 128 lanes wide.


def _lrelu(v):
    # nn.LeakyReLU(0.2)
    return jnp.where(v > 0, v, 0.2 * v)


def _round_up(n, m):
    return (n + m - 1) // m * m


def _pick_batch_tile(b_padded, cap=4096):
    """Largest power-of-two multiple of 8 that divides b_padded, capped for v7x VMEM."""
    t = 8
    while t * 2 <= min(b_padded, cap) and b_padded % (t * 2) == 0:
        t *= 2
    return t


# --------------------------------------------------------------------------
# Packed-slab layout (row offsets are all multiples of 8 -> tile-aligned views)
# --------------------------------------------------------------------------
def _layout(x_dim, p_dim, latent_dim, hidden_dim):
    L, H = latent_dim, hidden_dim
    assert 2 * H <= LANES, "fused (block-diagonal) hidden width must fit 128 lanes"
    assert x_dim + p_dim + 3 * L <= LANES, "output slab layout must fit 128 lanes"
    offs, r = {}, 0
    for name in ("w1", "w3", "w4", "w5", "w6"):  # w2 is folded into w3 host-side
        offs[name] = (r, LANES)
        r += LANES
    offs["bias"] = (r, 8)
    r += 8
    return offs, r


def pack_params(params, x_dim, p_dim, L, H):
    """Pack all Net.forward parameters into one tile-aligned (rows, 128) slab.

    Called ONCE at init; the per-call forward only consumes the packed slab.
    """
    (exw1, exb1, exw2, exb2, exwm, exbm, exwv, exbv,
     epw1, epb1, epw2, epb2, epwm, epbm,
     dxw1, dxb1, dxw2, dxb2, dxw3, dxb3,
     dpw1, dpb1, dpw2, dpb2, dpw3, dpb3) = params
    offs, total_rows = _layout(x_dim, p_dim, L, H)
    M0 = x_dim + p_dim                       # lane offset of mean in out slab
    slab = jnp.zeros((total_rows, LANES), jnp.float32)
    w1o = offs["w1"][0]; w3o = offs["w3"][0]; w4o = offs["w4"][0]
    w5o = offs["w5"][0]; w6o = offs["w6"][0]; bo = offs["bias"][0]

    # Fused encoder layer 1 (block-diag: x-branch -> lanes 0:H, p-branch -> H:2H).
    slab = slab.at[w1o:w1o + x_dim, 0:H].set(exw1)
    slab = slab.at[w1o + x_dim:w1o + M0, H:2 * H].set(epw1)

    # Encoder layer-2 folded into the heads (no activation between them):
    #   head = lrelu(layer1) @ (W2 @ W_head) + (b2 @ W_head + b_head)
    # Heads land directly at their final output-slab lane positions.
    slab = slab.at[w3o:w3o + H, M0:M0 + L].set(exw2 @ exwm)
    slab = slab.at[w3o:w3o + H, M0 + L:M0 + 2 * L].set(exw2 @ exwv)
    slab = slab.at[w3o + H:w3o + 2 * H, M0 + 2 * L:M0 + 3 * L].set(epw2 @ epwm)

    # Fused decoder layer 1, padded to 128 rows and placed at the head's lane
    # layout.  x-decoder (input z+s) pulls from the mean, sigma*eps and s lane
    # groups; p-decoder (input s) pulls from the s lane group only.
    slab = slab.at[w4o + M0:w4o + M0 + L, 0:H].set(dxw1)                  # mean lanes
    slab = slab.at[w4o + M0 + L:w4o + M0 + 2 * L, 0:H].set(dxw1)          # sigma*eps lanes
    slab = slab.at[w4o + M0 + 2 * L:w4o + M0 + 3 * L, 0:H].set(dxw1)      # s lanes
    slab = slab.at[w4o + M0 + 2 * L:w4o + M0 + 3 * L, H:2 * H].set(dpw1)  # s -> p-decoder

    # Fused decoder layer 2.
    slab = slab.at[w5o:w5o + H, 0:H].set(dxw2)
    slab = slab.at[w5o + H:w5o + 2 * H, H:2 * H].set(dpw2)
    # Fused decoder output layer: x_hat -> lanes 0:x_dim, p_hat -> x_dim:M0.
    slab = slab.at[w6o:w6o + H, 0:x_dim].set(dxw3)
    slab = slab.at[w6o + H:w6o + 2 * H, x_dim:M0].set(dpw3)

    # Bias rows (one row per fused layer), at the fused layers' output lanes.
    slab = slab.at[bo + 0, 0:H].set(exb1[0]); slab = slab.at[bo + 0, H:2 * H].set(epb1[0])
    slab = slab.at[bo + 1, M0:M0 + L].set((exb2 @ exwm + exbm)[0])
    slab = slab.at[bo + 1, M0 + L:M0 + 2 * L].set((exb2 @ exwv + exbv)[0])
    slab = slab.at[bo + 1, M0 + 2 * L:M0 + 3 * L].set((epb2 @ epwm + epbm)[0])
    slab = slab.at[bo + 2, 0:H].set(dxb1[0]); slab = slab.at[bo + 2, H:2 * H].set(dpb1[0])
    slab = slab.at[bo + 3, 0:H].set(dxb2[0]); slab = slab.at[bo + 3, H:2 * H].set(dpb2[0])
    slab = slab.at[bo + 4, 0:x_dim].set(dxb3[0]); slab = slab.at[bo + 4, x_dim:M0].set(dpb3[0])
    return slab


# --------------------------------------------------------------------------
# Kernel
# --------------------------------------------------------------------------
def _make_kernel(x_dim, p_dim, L, offs):
    M0 = x_dim + p_dim
    w1o = offs["w1"][0]; w3o = offs["w3"][0]; w4o = offs["w4"][0]
    w5o = offs["w5"][0]; w6o = offs["w6"][0]; bo = offs["bias"][0]

    def kernel(inp_ref, par_ref, out_ref):
        a0 = inp_ref[...]                       # (Bt,128): [x | p | 0 | eps | 0...]
        bb = par_ref[bo:bo + 8, :]              # (8,128): one bias row per fused layer

        def lin(act, wo, brow):
            w = par_ref[wo:wo + LANES, :]       # static, tile-aligned view
            return (jnp.dot(act, w, preferred_element_type=jnp.float32)
                    + bb[brow:brow + 1, :])

        # Fused Encoder_x / Encoder_p layer 1 (Linear + LeakyReLU).
        h1 = _lrelu(lin(a0, w1o, 0))            # lanes 0:H = hx1, H:2H = hp1
        # Encoder layer-2 folded into the heads: lanes M0..M0+3L = [mean|logvar|s].
        head = lin(h1, w3o, 1)

        # Reparameterization without any cross-lane movement:
        # eps was placed at the log-var lane group, so sigma*eps is computed
        # in-place and swapped in for the log-var lanes with one masked select.
        lane = jax.lax.broadcasted_iota(jnp.int32, head.shape, 1)
        lv_mask = (lane >= M0 + L) & (lane < M0 + 2 * L)
        sigma = jnp.exp(0.5 * jnp.where(lv_mask, head, 0.0))
        d0 = jnp.where(lv_mask, sigma * a0, head)
        # d0 lanes: mean | sigma*eps | s  -> w4 rows sum them into (z+s) / s.

        d1 = _lrelu(lin(d0, w4o, 2))            # fused decoder layer 1
        d2 = _lrelu(lin(d1, w5o, 3))            # fused decoder layer 2
        dec = lin(d2, w6o, 4)                   # lanes 0:x_dim = x_hat, x_dim:M0 = p_hat

        # dec nonzero only on lanes [0, M0); head only on [M0, M0+3L):
        # their sum is the packed output [x_hat | p_hat | mean | logvar | s | 0].
        out_ref[...] = dec + head

    return kernel


# --------------------------------------------------------------------------
# Wrapper (param slab is prepacked once and passed in)
# --------------------------------------------------------------------------
def net_forward(x, p, eps, param_slab, hidden_dim):
    """x: (B, x_dim), p: (B, p_dim), eps: (B, latent), param_slab from pack_params."""
    B, x_dim = x.shape
    p_dim = p.shape[1]
    L = eps.shape[1]
    offs, total_rows = _layout(x_dim, p_dim, L, hidden_dim)
    assert param_slab.shape == (total_rows, LANES)
    M0 = x_dim + p_dim

    # One lane-dense input slab built with a single concatenate.
    # eps goes to the log-var lane group [M0+L, M0+2L).
    pieces = [x.astype(jnp.float32), p.astype(jnp.float32),
              jnp.zeros((B, L), jnp.float32), eps.astype(jnp.float32)]
    tail = LANES - M0 - 2 * L
    if tail:
        pieces.append(jnp.zeros((B, tail), jnp.float32))
    inp = jnp.concatenate(pieces, axis=1)

    # Batch tiling: pad to a multiple of 8 sublanes, tile capped for v7x VMEM.
    Bp = _round_up(max(B, 8), 8)
    if Bp != B:
        inp = jnp.pad(inp, ((0, Bp - B), (0, 0)))
    b_tile = _pick_batch_tile(Bp)

    out = pl.pallas_call(
        _make_kernel(x_dim, p_dim, L, offs),
        out_shape=jax.ShapeDtypeStruct((Bp, LANES), jnp.float32),
        grid=(Bp // b_tile,),
        in_specs=[pl.BlockSpec((b_tile, LANES), lambda i: (i, 0)),
                  pl.BlockSpec((total_rows, LANES), lambda i: (0, 0))],
        out_specs=pl.BlockSpec((b_tile, LANES), lambda i: (i, 0)),
        compiler_params=pltpu.CompilerParams(
            dimension_semantics=("parallel",)),
    )(inp, param_slab)

    out = out[:B]
    x_hat = out[:, :x_dim]
    p_hat = out[:, x_dim:M0]
    mean_z = out[:, M0:M0 + L]
    log_var_z = out[:, M0 + L:M0 + 2 * L]
    s = out[:, M0 + 2 * L:M0 + 3 * L]
    return x_hat, p_hat, mean_z, log_var_z, s


# --------------------------------------------------------------------------
# Deterministic parameter construction (PyTorch-default-style uniform init).
# Weights stored as (in_features, out_features) so act @ W + b == PyTorch x@W.T+b.
# --------------------------------------------------------------------------
def init_linear(key, fan_in, fan_out):
    kw, kb = jax.random.split(key)
    bound = 1.0 / (fan_in ** 0.5)
    w = jax.random.uniform(kw, (fan_in, fan_out), jnp.float32, -bound, bound)
    b = jax.random.uniform(kb, (1, fan_out), jnp.float32, -bound, bound)
    return w, b


def build_params(key, x_dim, p_dim, latent_dim, hidden_dim):
    keys = jax.random.split(key, 14)
    params = []
    # Encoder_x
    params += init_linear(keys[0], x_dim, hidden_dim)
    params += init_linear(keys[1], hidden_dim, hidden_dim)
    params += init_linear(keys[2], hidden_dim, latent_dim)   # fc_mean
    params += init_linear(keys[3], hidden_dim, latent_dim)   # fc_var
    # Encoder_p (VAE=False)
    params += init_linear(keys[4], p_dim, hidden_dim)
    params += init_linear(keys[5], hidden_dim, hidden_dim)
    params += init_linear(keys[6], hidden_dim, latent_dim)   # fc_mean
    # Decoder_x
    params += init_linear(keys[7], latent_dim, hidden_dim)
    params += init_linear(keys[8], hidden_dim, hidden_dim)
    params += init_linear(keys[9], hidden_dim, x_dim)
    # Decoder_p
    params += init_linear(keys[10], latent_dim, hidden_dim)
    params += init_linear(keys[11], hidden_dim, hidden_dim)
    params += init_linear(keys[12], hidden_dim, p_dim)
    # TODO(synk): MINE module parameters are not needed by Net.forward.
    return params


def reference_forward(x, p, eps, params):
    (exw1, exb1, exw2, exb2, exwm, exbm, exwv, exbv,
     epw1, epb1, epw2, epb2, epwm, epbm,
     dxw1, dxb1, dxw2, dxb2, dxw3, dxb3,
     dpw1, dpb1, dpw2, dpb2, dpw3, dpb3) = params

    def lin(a, w, b):
        return a @ w + b

    hx = lin(_lrelu(lin(x, exw1, exb1)), exw2, exb2)
    mean_z = lin(hx, exwm, exbm)
    log_var_z = lin(hx, exwv, exbv)
    z = mean_z + jnp.exp(0.5 * log_var_z) * eps
    hp = lin(_lrelu(lin(p, epw1, epb1)), epw2, epb2)
    s = lin(hp, epwm, epbm)
    d = _lrelu(lin(z + s, dxw1, dxb1))
    d = _lrelu(lin(d, dxw2, dxb2))
    x_hat = lin(d, dxw3, dxb3)
    e = _lrelu(lin(s, dpw1, dpb1))
    e = _lrelu(lin(e, dpw2, dpb2))
    p_hat = lin(e, dpw3, dpb3)
    return x_hat, p_hat, mean_z, log_var_z, s


if __name__ == "__main__":
    B = 8
    x_dim = 32
    p_dim = 16
    latent_dim = 8
    hidden_dim = 32

    key = jax.random.PRNGKey(0)
    kx, kp, keps, kparams = jax.random.split(key, 4)
    x = jax.random.normal(kx, (B, x_dim), jnp.float32)
    p = jax.random.normal(kp, (B, p_dim), jnp.float32)
    eps = jax.random.normal(keps, (B, latent_dim), jnp.float32)  # randn_like(var)
    params = build_params(kparams, x_dim, p_dim, latent_dim, hidden_dim)

    # Parameter packing done ONCE (outside the per-call forward path).
    param_slab = jax.block_until_ready(
        pack_params(params, x_dim, p_dim, latent_dim, hidden_dim))

    fwd = jax.jit(functools.partial(net_forward, hidden_dim=hidden_dim))
    outs = jax.block_until_ready(fwd(x, p, eps, param_slab))
    refs = reference_forward(x, p, eps, params)
    for o, r in zip(outs, refs):
        assert o.shape == r.shape and o.dtype == r.dtype
        assert jnp.allclose(o, r, atol=1e-3, rtol=1e-3), "mismatch vs reference"

    print("KERNEL_OK")
</pallas_src>

<mosaic_0001>
module attributes {stable_mosaic.version = 11 : i64} {
  func.func @kernel(%arg0: i32, %arg1: memref<8x128xf32, #tpu.memory_space<vmem>>, %arg2: memref<648x128xf32, #tpu.memory_space<vmem>>, %arg3: memref<8x128xf32, #tpu.memory_space<vmem>>) attributes {dimension_semantics = [#tpu.dimension_semantics<parallel>], iteration_bounds = array<i64: 1>, scalar_prefetch = 0 : i64, scratch_operands = 0 : i64, tpu.core_type = #tpu.core_type<tc>, window_params = [{transform_indices = @transform_0, window_bounds = array<i64: 8, 128>}, {pipeline_mode = #tpu.pipeline_mode<synchronous>, transform_indices = @transform_1, window_bounds = array<i64: 648, 128>}, {transform_indices = @transform_2, window_bounds = array<i64: 8, 128>}]} {
    %c0 = arith.constant 0 : index
    %c0_0 = arith.constant 0 : index
    %0 = vector.load %arg1[%c0, %c0_0] : memref<8x128xf32, #tpu.memory_space<vmem>>, vector<8x128xf32>
    %c640 = arith.constant 640 : index
    %c0_1 = arith.constant 0 : index
    %1 = vector.load %arg2[%c640, %c0_1] : memref<648x128xf32, #tpu.memory_space<vmem>>, vector<8x128xf32>
    %c0_2 = arith.constant 0 : index
    %c0_3 = arith.constant 0 : index
    %2 = vector.load %arg2[%c0_2, %c0_3] : memref<648x128xf32, #tpu.memory_space<vmem>>, vector<128x128xf32>
    %cst = arith.constant dense<0.000000e+00> : vector<8x128xf32>
    %3 = tpu.matmul %0, %2, %cst {dimension_numbers = #tpu.dot_dimension_numbers<[1], [0], [0], [1], [0, 0, 1, 1], [], []>} : vector<8x128xf32>, vector<128x128xf32>, vector<8x128xf32> -> vector<8x128xf32>
    %4 = vector.extract_strided_slice %1 {offsets = [0, 0], sizes = [1, 128], strides = [1, 1]} : vector<8x128xf32> to vector<1x128xf32>
    %5 = vector.broadcast %4 : vector<1x128xf32> to vector<8x128xf32>
    %6 = arith.addf %3, %5 : vector<8x128xf32>
    %cst_4 = arith.constant 0.000000e+00 : f32
    %7 = vector.broadcast %cst_4 : f32 to vector<8x128xf32>
    %8 = arith.cmpf ogt, %6, %7 : vector<8x128xf32>
    %cst_5 = arith.constant 2.000000e-01 : f32
    %9 = vector.broadcast %cst_5 : f32 to vector<8x128xf32>
    %10 = arith.mulf %9, %6 : vector<8x128xf32>
    %11 = arith.select %8, %6, %10 : vector<8x128xi1>, vector<8x128xf32>
    %c128 = arith.constant 128 : index
    %c0_6 = arith.constant 0 : index
    %12 = vector.load %arg2[%c128, %c0_6] : memref<648x128xf32, #tpu.memory_space<vmem>>, vector<128x128xf32>
    %cst_7 = arith.constant dense<0.000000e+00> : vector<8x128xf32>
    %13 = tpu.matmul %11, %12, %cst_7 {dimension_numbers = #tpu.dot_dimension_numbers<[1], [0], [0], [1], [0, 0, 1, 1], [], []>} : vector<8x128xf32>, vector<128x128xf32>, vector<8x128xf32> -> vector<8x128xf32>
    %14 = vector.extract_strided_slice %1 {offsets = [1, 0], sizes = [1, 128], strides = [1, 1]} : vector<8x128xf32> to vector<1x128xf32>
    %15 = vector.broadcast %14 : vector<1x128xf32> to vector<8x128xf32>
    %16 = arith.addf %13, %15 : vector<8x128xf32>
    %17 = tpu.iota {dimensions = array<i32: 1>} : vector<8x128xi32>
    %c56_i32 = arith.constant 56 : i32
    %18 = vector.broadcast %c56_i32 : i32 to vector<8x128xi32>
    %19 = arith.cmpi sge, %17, %18 : vector<8x128xi32>
    %c64_i32 = arith.constant 64 : i32
    %20 = vector.broadcast %c64_i32 : i32 to vector<8x128xi32>
    %21 = arith.cmpi slt, %17, %20 : vector<8x128xi32>
    %22 = arith.andi %19, %21 : vector<8x128xi1>
    %cst_8 = arith.constant 0.000000e+00 : f32
    %23 = vector.broadcast %cst_8 : f32 to vector<8x128xf32>
    %24 = arith.select %22, %16, %23 : vector<8x128xi1>, vector<8x128xf32>
    %cst_9 = arith.constant 5.000000e-01 : f32
    %25 = vector.broadcast %cst_9 : f32 to vector<8x128xf32>
    %26 = arith.mulf %25, %24 : vector<8x128xf32>
    %27 = math.exp %26 : vector<8x128xf32>
    %28 = arith.mulf %27, %0 : vector<8x128xf32>
    %29 = arith.select %22, %28, %16 : vector<8x128xi1>, vector<8x128xf32>
    %c256 = arith.constant 256 : index
    %c0_10 = arith.constant 0 : index
    %30 = vector.load %arg2[%c256, %c0_10] : memref<648x128xf32, #tpu.memory_space<vmem>>, vector<128x128xf32>
    %cst_11 = arith.constant dense<0.000000e+00> : vector<8x128xf32>
    %31 = tpu.matmul %29, %30, %cst_11 {dimension_numbers = #tpu.dot_dimension_numbers<[1], [0], [0], [1], [0, 0, 1, 1], [], []>} : vector<8x128xf32>, vector<128x128xf32>, vector<8x128xf32> -> vector<8x128xf32>
    %32 = vector.extract_strided_slice %1 {offsets = [2, 0], sizes = [1, 128], strides = [1, 1]} : vector<8x128xf32> to vector<1x128xf32>
    %33 = vector.broadcast %32 : vector<1x128xf32> to vector<8x128xf32>
    %34 = arith.addf %31, %33 : vector<8x128xf32>
    %cst_12 = arith.constant 0.000000e+00 : f32
    %35 = vector.broadcast %cst_12 : f32 to vector<8x128xf32>
    %36 = arith.cmpf ogt, %34, %35 : vector<8x128xf32>
    %cst_13 = arith.constant 2.000000e-01 : f32
    %37 = vector.broadcast %cst_13 : f32 to vector<8x128xf32>
    %38 = arith.mulf %37, %34 : vector<8x128xf32>
    %39 = arith.select %36, %34, %38 : vector<8x128xi1>, vector<8x128xf32>
    %c384 = arith.constant 384 : index
    %c0_14 = arith.constant 0 : index
    %40 = vector.load %arg2[%c384, %c0_14] : memref<648x128xf32, #tpu.memory_space<vmem>>, vector<128x128xf32>
    %cst_15 = arith.constant dense<0.000000e+00> : vector<8x128xf32>
    %41 = tpu.matmul %39, %40, %cst_15 {dimension_numbers = #tpu.dot_dimension_numbers<[1], [0], [0], [1], [0, 0, 1, 1], [], []>} : vector<8x128xf32>, vector<128x128xf32>, vector<8x128xf32> -> vector<8x128xf32>
    %42 = vector.extract_strided_slice %1 {offsets = [3, 0], sizes = [1, 128], strides = [1, 1]} : vector<8x128xf32> to vector<1x128xf32>
    %43 = vector.broadcast %42 : vector<1x128xf32> to vector<8x128xf32>
    %44 = arith.addf %41, %43 : vector<8x128xf32>
    %cst_16 = arith.constant 0.000000e+00 : f32
    %45 = vector.broadcast %cst_16 : f32 to vector<8x128xf32>
    %46 = arith.cmpf ogt, %44, %45 : vector<8x128xf32>
    %cst_17 = arith.constant 2.000000e-01 : f32
    %47 = vector.broadcast %cst_17 : f32 to vector<8x128xf32>
    %48 = arith.mulf %47, %44 : vector<8x128xf32>
    %49 = arith.select %46, %44, %48 : vector<8x128xi1>, vector<8x128xf32>
    %c512 = arith.constant 512 : index
    %c0_18 = arith.constant 0 : index
    %50 = vector.load %arg2[%c512, %c0_18] : memref<648x128xf32, #tpu.memory_space<vmem>>, vector<128x128xf32>
    %cst_19 = arith.constant dense<0.000000e+00> : vector<8x128xf32>
    %51 = tpu.matmul %49, %50, %cst_19 {dimension_numbers = #tpu.dot_dimension_numbers<[1], [0], [0], [1], [0, 0, 1, 1], [], []>} : vector<8x128xf32>, vector<128x128xf32>, vector<8x128xf32> -> vector<8x128xf32>
    %52 = vector.extract_strided_slice %1 {offsets = [4, 0], sizes = [1, 128], strides = [1, 1]} : vector<8x128xf32> to vector<1x128xf32>
    %53 = vector.broadcast %52 : vector<1x128xf32> to vector<8x128xf32>
    %54 = arith.addf %51, %53 : vector<8x128xf32>
    %55 = arith.addf %54, %16 : vector<8x128xf32>
    %c0_20 = arith.constant 0 : index
    %c0_21 = arith.constant 0 : index
    %56 = vector.load %arg3[%c0_20, %c0_21] : memref<8x128xf32, #tpu.memory_space<vmem>>, vector<8x128xf32>
    tpu.vector_store %arg3[%c0_20, %c0_21], %55 {strides = array<i32>} : memref<8x128xf32, #tpu.memory_space<vmem>>, vector<8x128xf32>,
    return
  }
  func.func @transform_0(%arg0: i32) -> (i32, i32) {
    %c0_i32 = arith.constant 0 : i32
    %c0_i32_0 = arith.constant 0 : i32
    return %arg0, %c0_i32 : i32, i32
  }
  func.func @transform_1(%arg0: i32) -> (i32, i32) {
    %c0_i32 = arith.constant 0 : i32
    %c0_i32_0 = arith.constant 0 : i32
    %c0_i32_1 = arith.constant 0 : i32
    return %c0_i32, %c0_i32_0 : i32, i32
  }
  func.func @transform_2(%arg0: i32) -> (i32, i32) {
    %c0_i32 = arith.constant 0 : i32
    %c0_i32_0 = arith.constant 0 : i32
    return %arg0, %c0_i32 : i32, i32
  }
}

</mosaic_0001>

<bundles_post_ra>
// kernel: net_forward.1
= control target key start
LH: loop header
LB: loop body
LE: loop exit
PB: predicated region body
PF: predicated region fallthrough
CT: control target
= control target key end

     0   :  { %7 = vsyncpa [#allocation3], 0  ;;  %s916_s9 = smov [#allocation2]   ;;  %s1030_s0 = inlined_call_operand.vmem [shape: f32[8,128], index: 0, kind: input, shape index: {}]   ;;  %s1031_s1 = inlined_call_operand.hbm [shape: f32[648,128], index: 1, kind: input, shape index: {}]   ;;  %s1032_s2 = inlined_call_operand.vmem [shape: f32[8,128], index: 2, kind: output, shape index: {}]  }
   0x1   :  { %s15_s10 = sshll.u32 %s916_s9, 4  ;;  %s892_s13 = scalar_lea.hbm %s1031_s1, 10368  ;;  %s16_s10 = int_to_ptr.vmem [resolvable:$true] %s15_s10 }
   0x2   :  { %p893_p0 = scmp.ne.s32.totalorder %s1031_s1, %s892_s13  ;;  %p896_p1 = scmp.lt.u32.totalorder %s892_s13, %s1031_s1 }
   0x4   :  { %p898_p2 = pnand %p896_p1, %p893_p0 }
   0x6   :  { %901 = shalt.err (!%p898_p2)
}
   0x7   :  { %s902_s18 = scalar_lea.vmem %s16_s10, 10368  ;;  %p907_p4 = scmp.lt.s32.totalorder %s16_s10, %s16_s10 }
   0x8   :  { %p903_p3 = scmp.ne.s32.totalorder %s16_s10, %s902_s18  ;;  %p908_p5 = scmp.lt.s32.totalorder %s902_s18, %s902_s18 }
   0xa   :  { %p909_p6 = por %p908_p5, %p907_p4 }
   0xc   :  { %p910_p7 = pnand %p909_p6, %p903_p3 }
   0xe   :  { %913 = shalt.err (!%p910_p7)
}
   0xf   :  { %s917_s19 = smov 128   ;;  %s918_s20 = smov 8  }
  0x10   :  { %21 = dma.hbm_to_vmem [thread:$0]  %s1031_s1, 10368, %s16_s10, [#allocation3], %s917_s19, %s917_s19, %s918_s20  }
  0x11   :  { %914 = dma.done.wait [#allocation3], 10368  }
  0x12   :  { %915 = vsyncadd [#allocation3], 4294956928  ;;  %v919_v0 = vmov 0.0|0.0   ;;  %vm920_vm0 = vmmov 0   ;;  %v921_v1 = vmov 0.0   ;;  %v27_v2 = vld [vmem:[#allocation2] sm:$0xff]  ;;  %v43_v60 = vlaneseq }
  0x13   :  { %764 = vmatprep.subr.bf16.mxu0 %v919_v0  ;;  %621 = vmatprep.mubr.msk.f32.mxu0 %vm920_vm0, %v921_v1  ;;  %v28_v3 = vld [vmem:[#allocation2 + $0x8] sm:$0xff]  ;;  %v29_v4 = vld [vmem:[#allocation2 + $0x10] sm:$0xff]  ;;  %v30_v6 = vld [vmem:[#allocation2 + $0x18] sm:$0xff] }
  0x14   :  { %788 = vmatprep.subr.bf16.mxu1 %v919_v0  ;;  %656 = vmatprep.mubr.msk.f32.mxu1 %vm920_vm0, %v921_v1  ;;  %v765_v5 = vpack.c.bf16 %v28_v3, %v27_v2  ;;  %v768_v7 = vpack.c.bf16 %v30_v6, %v29_v4  ;;  %v31_v8 = vld [vmem:[#allocation2 + $0x20] sm:$0xff]  ;;  %v32_v9 = vld [vmem:[#allocation2 + $0x28] sm:$0xff]  ;;  %v122_v12 = vld [vmem:[#allocation2 + $0x90] sm:$0xff]  ;;  %v983_v61 = vshrl.u32 %v43_v60, 7 }
  0x15   :  { %v120_v10 = vld [vmem:[#allocation2 + $0x80] sm:$0xff]  ;;  %v121_v11 = vld [vmem:[#allocation2 + $0x88] sm:$0xff]  ;;  %v123_v13 = vld [vmem:[#allocation2 + $0x98] sm:$0xff]  ;;  %v771_v14 = vpack.c.bf16 %v32_v9, %v31_v8 }
  0x16   :  { %766 = vmatpush3.bf16.msra.mxu0 %v765_v5  ;;  %v789_v15 = vpack.c.bf16 %v121_v11, %v120_v10  ;;  %v33_v16 = vld [vmem:[#allocation2 + $0x30] sm:$0xff]  ;;  %v34_v17 = vld [vmem:[#allocation2 + $0x38] sm:$0xff]  ;;  %v792_v18 = vpack.c.bf16 %v123_v13, %v122_v12  ;;  %v124_v19 = vld [vmem:[#allocation2 + $0xa0] sm:$0xff]  ;;  %v45_v62 = vsub.s32 0, %v983_v61 }
  0x17   :  { %767 = vmatprep.subr.bf16.mxu0 %v919_v0  ;;  %v125_v20 = vld [vmem:[#allocation2 + $0xa8] sm:$0xff]  ;;  %v774_v21 = vpack.c.bf16 %v34_v17, %v33_v16  ;;  %v35_v22 = vld [vmem:[#allocation2 + $0x40] sm:$0xff]  ;;  %v126_v25 = vld [vmem:[#allocation2 + $0xb0] sm:$0xff] }
  0x18   :  { %790 = vmatpush3.bf16.msra.mxu1 %v789_v15  ;;  %v36_v23 = vld [vmem:[#allocation2 + $0x48] sm:$0xff]  ;;  %v795_v24 = vpack.c.bf16 %v125_v20, %v124_v19  ;;  %v127_v26 = vld [vmem:[#allocation2 + $0xb8] sm:$0xff]  ;;  %v37_v28 = vld [vmem:[#allocation2 + $0x50] sm:$0xff] }
  0x19   :  { %791 = vmatprep.subr.bf16.mxu1 %v919_v0  ;;  %v777_v27 = vpack.c.bf16 %v36_v23, %v35_v22  ;;  %v38_v29 = vld [vmem:[#allocation2 + $0x58] sm:$0xff]  ;;  %v798_v30 = vpack.c.bf16 %v127_v26, %v126_v25  ;;  %v128_v31 = vld [vmem:[#allocation2 + $0xc0] sm:$0xff]  ;;  %v129_v32 = vld [vmem:[#allocation2 + $0xc8] sm:$0xff] }
  0x1a   :  { %769 = vmatpush3.bf16.msra.mxu0 %v768_v7  ;;  %v780_v33 = vpack.c.bf16 %v38_v29, %v37_v28  ;;  %v39_v34 = vld [vmem:[#allocation2 + $0x60] sm:$0xff]  ;;  %v40_v35 = vld [vmem:[#allocation2 + $0x68] sm:$0xff]  ;;  %v801_v36 = vpack.c.bf16 %v129_v32, %v128_v31  ;;  %v130_v37 = vld [vmem:[#allocation2 + $0xd0] sm:$0xff] }
  0x1b   :  { %770 = vmatprep.subr.bf16.mxu0 %v919_v0  ;;  %v131_v38 = vld [vmem:[#allocation2 + $0xd8] sm:$0xff]  ;;  %v783_v39 = vpack.c.bf16 %v40_v35, %v39_v34  ;;  %v41_v40 = vld [vmem:[#allocation2 + $0x70] sm:$0xff]  ;;  %v132_v43 = vld [vmem:[#allocation2 + $0xe0] sm:$0xff] }
  0x1c   :  { %793 = vmatpush3.bf16.msra.mxu1 %v792_v18  ;;  %v42_v41 = vld [vmem:[#allocation2 + $0x78] sm:$0xff]  ;;  %v804_v42 = vpack.c.bf16 %v131_v38, %v130_v37  ;;  %v133_v44 = vld [vmem:[#allocation2 + $0xe8] sm:$0xff]  ;;  %v971_v47 = vld [vmem:[%s1030_s0] sm:$0xff] }
  0x1d   :  { %794 = vmatprep.subr.bf16.mxu1 %v919_v0  ;;  %v786_v45 = vpack.c.bf16 %v42_v41, %v41_v40  ;;  %v807_v46 = vpack.c.bf16 %v133_v44, %v132_v43  ;;  %v134_v48 = vld [vmem:[#allocation2 + $0xf0] sm:$0xff]  ;;  %v135_v49 = vld [vmem:[#allocation2 + $0xf8] sm:$0xff]  ;;  %v221_v51 = vld [vmem:[#allocation2 + $0x100] sm:$0xff]  ;;  %v138_v44 = vsub.s32 1, %v983_v61 }
  0x1e   :  { %772 = vmatpush3.bf16.msra.mxu0 %v771_v14  ;;  %v810_v50 = vpack.c.bf16 %v135_v49, %v134_v48  ;;  %v222_v52 = vld [vmem:[#allocation2 + $0x108] sm:$0xff]  ;;  %v223_v53 = vld [vmem:[#allocation2 + $0x110] sm:$0xff]  ;;  %v224_v55 = vld [vmem:[#allocation2 + $0x118] sm:$0xff] }
  0x1f   :  { %773 = vmatprep.subr.bf16.mxu0 %v919_v0  ;;  %v813_v54 = vpack.c.bf16 %v222_v52, %v221_v51  ;;  %v816_v56 = vpack.c.bf16 %v224_v55, %v223_v53  ;;  %v225_v57 = vld [vmem:[#allocation2 + $0x120] sm:$0xff]  ;;  %v226_v58 = vld [vmem:[#allocation2 + $0x128] sm:$0xff]  ;;  %v227_v8 = vld [vmem:[#allocation2 + $0x130] sm:$0xff] }
  0x20   :  { %796 = vmatpush3.bf16.msra.mxu1 %v795_v24  ;;  %v819_v59 = vpack.c.bf16 %v226_v58, %v225_v57  ;;  %v986_v63 = vld [vmem:[#allocation2 + $0x280] sm:$0xff]  ;;  %v228_v9 = vld [vmem:[#allocation2 + $0x138] sm:$0xff]  ;;  %v230_v12 = vld [vmem:[#allocation2 + $0x148] sm:$0xff] }
  0x21   :  { %797 = vmatprep.subr.bf16.mxu1 %v919_v0  ;;  %v46_v2 = vrot.slane %v986_v63, %v45_v62  ;;  %v822_v10 = vpack.c.bf16 %v228_v9, %v227_v8  ;;  %v229_v11 = vld [vmem:[#allocation2 + $0x140] sm:$0xff]  ;;  %v231_v14 = vld [vmem:[#allocation2 + $0x150] sm:$0xff]  ;;  %v232_v15 = vld [vmem:[#allocation2 + $0x158] sm:$0xff] }
  0x22   :  { %775 = vmatpush3.bf16.msra.mxu0 %v774_v21  ;;  %v825_v13 = vpack.c.bf16 %v230_v12, %v229_v11  ;;  %v233_v16 = vld [vmem:[#allocation2 + $0x160] sm:$0xff]  ;;  %v828_v17 = vpack.c.bf16 %v232_v15, %v231_v14  ;;  %v234_v18 = vld [vmem:[#allocation2 + $0x168] sm:$0xff]  ;;  %v235_v20 = vld [vmem:[#allocation2 + $0x170] sm:$0xff] }
  0x23   :  { %776 = vmatprep.subr.bf16.mxu0 %v919_v0  ;;  %v831_v19 = vpack.c.bf16 %v234_v18, %v233_v16  ;;  %v236_v21 = vld [vmem:[#allocation2 + $0x178] sm:$0xff]  ;;  %v314_v23 = vld [vmem:[#allocation2 + $0x180] sm:$0xff]  ;;  %v315_v24 = vld [vmem:[#allocation2 + $0x188] sm:$0xff] }
  0x24   :  { %799 = vmatpush3.bf16.msra.mxu1 %v798_v30  ;;  %v834_v22 = vpack.c.bf16 %v236_v21, %v235_v20  ;;  %v316_v25 = vld [vmem:[#allocation2 + $0x190] sm:$0xff]  ;;  %v837_v26 = vpack.c.bf16 %v315_v24, %v314_v23  ;;  %v318_v29 = vld [vmem:[#allocation2 + $0x1a0] sm:$0xff]  ;;  %v319_v30 = vld [vmem:[#allocation2 + $0x1a8] sm:$0xff] }
  0x25   :  { %800 = vmatprep.subr.bf16.mxu1 %v919_v0  ;;  %v843_v31 = vpack.c.bf16 %v319_v30, %v318_v29  ;;  %v320_v32 = vld [vmem:[#allocation2 + $0x1b0] sm:$0xff]  ;;  %v322_v35 = vld [vmem:[#allocation2 + $0x1c0] sm:$0xff]  ;;  %v329_v58 = vld [vmem:[#allocation2 + $0x1f8] sm:$0xff]  ;;  %v332_v29 = vsub.s32 3, %v983_v61 }
  0x26   :  { %778 = vmatpush3.bf16.msra.mxu0 %v777_v27  ;;  %v317_v27 = vld [vmem:[#allocation2 + $0x198] sm:$0xff]  ;;  %v324_v38 = vld [vmem:[#allocation2 + $0x1d0] sm:$0xff]  ;;  %v326_v41 = vld [vmem:[#allocation2 + $0x1e0] sm:$0xff] }
  0x27   :  { %779 = vmatprep.subr.bf16.mxu0 %v919_v0  ;;  %v840_v28 = vpack.c.bf16 %v317_v27, %v316_v25  ;;  %v328_v57 = vld [vmem:[#allocation2 + $0x1f0] sm:$0xff]  ;;  %v408_v62 = vld [vmem:[#allocation2 + $0x208] sm:$0xff]  ;;  %v414_v8 = vld [vmem:[#allocation2 + $0x238] sm:$0xff]  ;;  %v333_v30 = vrot.slane %v986_v63, %v332_v29 }
  0x28   :  { %802 = vmatpush3.bf16.msra.mxu1 %v801_v36  ;;  %v323_v36 = vld [vmem:[#allocation2 + $0x1c8] sm:$0xff]  ;;  %v418_v14 = vld [vmem:[#allocation2 + $0x258] sm:$0xff]  ;;  %v419_v16 = vld [vmem:[#allocation2 + $0x260] sm:$0xff] }
  0x29   :  { %803 = vmatprep.subr.bf16.mxu1 %v919_v0  ;;  %v849_v37 = vpack.c.bf16 %v323_v36, %v322_v35  ;;  %v416_v11 = vld [vmem:[#allocation2 + $0x248] sm:$0xff]  ;;  %v422_v27 = vld [vmem:[#allocation2 + $0x278] sm:$0xff]  ;;  %v425_v35 = vsub.s32 4, %v983_v61 }
  0x2a   :  { %781 = vmatpush3.bf16.msra.mxu0 %v780_v33  ;;  %v321_v33 = vld [vmem:[#allocation2 + $0x1b8] sm:$0xff] }
  0x2b   :  { %782 = vmatprep.subr.bf16.mxu0 %v919_v0  ;;  %v846_v34 = vpack.c.bf16 %v321_v33, %v320_v32  ;;  %v426_v36 = vrot.slane %v986_v63, %v425_v35 }
  0x2c   :  { %805 = vmatpush3.bf16.msra.mxu1 %v804_v42  ;;  %v327_v42 = vld [vmem:[#allocation2 + $0x1e8] sm:$0xff] }
  0x2d   :  { %806 = vmatprep.subr.bf16.mxu1 %v919_v0  ;;  %v855_v43 = vpack.c.bf16 %v327_v42, %v326_v41 }
  0x2e   :  { %784 = vmatpush3.bf16.msra.mxu0 %v783_v39  ;;  %v325_v39 = vld [vmem:[#allocation2 + $0x1d8] sm:$0xff] }
  0x2f   :  { %785 = vmatprep.subr.bf16.mxu0 %v919_v0  ;;  %v852_v40 = vpack.c.bf16 %v325_v39, %v324_v38 }
  0x30   :  { %808 = vmatpush3.bf16.msra.mxu1 %v807_v46  ;;  %v139_v46 = vrot.slane %v986_v63, %v138_v44 }
  0x31   :  { %809 = vmatprep.subr.bf16.mxu1 %v919_v0 }
  0x32   :  { %787 = vmatpush3.bf16.msra.mxu0 %v786_v45  ;;  %v211_v45 = vand.u32 127, %v43_v60  ;;  %v407_v60 = vld [vmem:[#allocation2 + $0x200] sm:$0xff] }
  0x33   :  { %812 = vmatprep.subr.bf16.mxu0 %v919_v0 }
  0x34   :  { %811 = vmatpush3.bf16.msra.mxu1 %v810_v50  ;;  %vm212_vm2 = vcmp.ge.s32.totalorder %v211_v45, 56  ;;  %vm213_vm3 = vcmp.lt.s32.totalorder %v211_v45, 64 }
  0x35   :  { %622 = vmatmul.mubr.f32.vlgmr.msra.gmra.mrb[0].mxu0 %v971_v47  ;;  %836 = vmatprep.subr.bf16.mxu1 %v919_v0  ;;  %vm214_vm4 = vmand %vm212_vm2, %vm213_vm3 }
  0x36   :  { %691 = vmatprep.mubr.msk.f32.mxu0 %vm920_vm0, %v921_v1  ;;  %814 = vmatpush3.bf16.msra.mxu0 %v813_v54 }
  0x37   :  { %815 = vmatprep.subr.bf16.mxu0 %v919_v0 }
  0x3a   :  { %817 = vmatpush3.bf16.msra.mxu0 %v816_v56 }
  0x3b   :  { %818 = vmatprep.subr.bf16.mxu0 %v919_v0 }
  0x3e   :  { %820 = vmatpush3.bf16.msra.mxu0 %v819_v59  ;;  %v858_v59 = vpack.c.bf16 %v329_v58, %v328_v57 }
  0x3f   :  { %821 = vmatprep.subr.bf16.mxu0 %v919_v0 }
  0x42   :  { %823 = vmatpush3.bf16.msra.mxu0 %v822_v10  ;;  %v415_v10 = vld [vmem:[#allocation2 + $0x240] sm:$0xff] }
  0x43   :  { %824 = vmatprep.subr.bf16.mxu0 %v919_v0  ;;  %v873_v12 = vpack.c.bf16 %v416_v11, %v415_v10 }
  0x46   :  { %826 = vmatpush3.bf16.msra.mxu0 %v825_v13  ;;  %v417_v13 = vld [vmem:[#allocation2 + $0x250] sm:$0xff] }
  0x47   :  { %827 = vmatprep.subr.bf16.mxu0 %v919_v0  ;;  %v876_v15 = vpack.c.bf16 %v418_v14, %v417_v13 }
  0x4a   :  { %829 = vmatpush3.bf16.msra.mxu0 %v828_v17  ;;  %v420_v17 = vld [vmem:[#allocation2 + $0x268] sm:$0xff] }
  0x4b   :  { %830 = vmatprep.subr.bf16.mxu0 %v919_v0  ;;  %v879_v18 = vpack.c.bf16 %v420_v17, %v419_v16 }
  0x4e   :  { %832 = vmatpush3.bf16.msra.mxu0 %v831_v19  ;;  %v239_v19 = vsub.s32 2, %v983_v61 }
  0x4f   :  { %833 = vmatprep.subr.bf16.mxu0 %v919_v0 }
  0x50   :  { %v240_v20 = vrot.slane %v986_v63, %v239_v19 }
  0x52   :  { %835 = vmatpush3.bf16.msra.mxu0 %v834_v22 }
  0x53   :  { %860 = vmatprep.subr.bf16.mxu0 %v919_v0 }
 0x108   :  { %v113_v3 = vpop.f32.mrb[0].mxu0 }
 0x109   :  { %v114_v4 = vadd.f32 %v113_v3, %v46_v2  ;;  %v623_v5 = vpop.f32.mrb[1].mxu0  ;;  %v409_v2 = vld [vmem:[#allocation2 + $0x210] sm:$0xff]  ;;  %v861_v3 = vpack.c.bf16 %v408_v62, %v407_v60 }
 0x10b   :  { %v118_v6 = vmul.f32 0.2, %v114_v4  ;;  %vm117_vm1 = vcmp.gt.f32.partialorder %v114_v4, 0.0 }
 0x10d   :  { %v119_v7 = vsel %vm117_vm1, %v114_v4, %v118_v6  ;;  %v410_v4 = vld [vmem:[#allocation2 + $0x218] sm:$0xff]  ;;  %v412_v6 = vld [vmem:[#allocation2 + $0x228] sm:$0xff] }
 0x10e   :  { %657 = vmatmul.mubr.f32.vlgmr.msra.gmra.mrb[0].mxu1 %v119_v7  ;;  %v864_v5 = vpack.c.bf16 %v410_v4, %v409_v2 }
 0x10f   :  { %726 = vmatprep.mubr.msk.f32.mxu1 %vm920_vm0, %v921_v1  ;;  %838 = vmatpush3.bf16.msra.mxu1 %v837_v26  ;;  %v421_v26 = vld [vmem:[#allocation2 + $0x270] sm:$0xff] }
 0x110   :  { %839 = vmatprep.subr.bf16.mxu1 %v919_v0 }
 0x113   :  { %841 = vmatpush3.bf16.msra.mxu1 %v840_v28  ;;  %v882_v28 = vpack.c.bf16 %v422_v27, %v421_v26 }
 0x114   :  { %842 = vmatprep.subr.bf16.mxu1 %v919_v0 }
 0x117   :  { %844 = vmatpush3.bf16.msra.mxu1 %v843_v31 }
 0x118   :  { %845 = vmatprep.subr.bf16.mxu1 %v919_v0 }
 0x11b   :  { %847 = vmatpush3.bf16.msra.mxu1 %v846_v34 }
 0x11c   :  { %848 = vmatprep.subr.bf16.mxu1 %v919_v0 }
 0x11f   :  { %850 = vmatpush3.bf16.msra.mxu1 %v849_v37 }
 0x120   :  { %851 = vmatprep.subr.bf16.mxu1 %v919_v0 }
 0x123   :  { %853 = vmatpush3.bf16.msra.mxu1 %v852_v40 }
 0x124   :  { %854 = vmatprep.subr.bf16.mxu1 %v919_v0 }
 0x127   :  { %856 = vmatpush3.bf16.msra.mxu1 %v855_v43 }
 0x128   :  { %857 = vmatprep.subr.bf16.mxu1 %v919_v0 }
 0x12b   :  { %859 = vmatpush3.bf16.msra.mxu1 %v858_v59 }
 0x1e1   :  { %v206_v48 = vpop.f32.mrb[0].mxu1 }
 0x1e2   :  { %v1006_v49 = vadd.f32 %v206_v48, %v139_v46  ;;  %v658_v50 = vpop.f32.mrb[1].mxu1 }
 0x1e4   :  { %v215_v51 = vsel %vm214_vm4, %v1006_v49, 0.0 }
 0x1e5   :  { %v216_v52 = vmul.f32 0.5, %v215_v51 }
 0x1e7   :  { %v217_v53 = vmul.f32 1.442695, %v216_v52 }
 0x1e9   :  { %890 = vpow2.f32 %v217_v53 }
 0x1f3   :  { %v891_v54 = vpop.eup %890 }
 0x1f4   :  { %v219_v55 = vmul.f32 %v891_v54, %v971_v47  ;;  %v411_v47 = vld [vmem:[#allocation2 + $0x220] sm:$0xff] }
 0x1f5   :  { %v867_v7 = vpack.c.bf16 %v412_v6, %v411_v47 }
 0x1f6   :  { %v220_v56 = vsel %vm214_vm4, %v219_v55, %v1006_v49 }
 0x1f7   :  { %692 = vmatmul.mubr.f32.vlgmr.msra.gmra.mrb[2].mxu0 %v220_v56 }
 0x1f8   :  { %761 = vmatprep.mubr.msk.f32.mxu0 %vm920_vm0, %v921_v1  ;;  %862 = vmatpush3.bf16.msra.mxu0 %v861_v3  ;;  %v413_v1 = vld [vmem:[#allocation2 + $0x230] sm:$0xff] }
 0x1f9   :  { %863 = vmatprep.subr.bf16.mxu0 %v919_v0  ;;  %v870_v9 = vpack.c.bf16 %v414_v8, %v413_v1 }
 0x1fc   :  { %865 = vmatpush3.bf16.msra.mxu0 %v864_v5 }
 0x1fd   :  { %866 = vmatprep.subr.bf16.mxu0 %v919_v0 }
 0x200   :  { %868 = vmatpush3.bf16.msra.mxu0 %v867_v7 }
 0x201   :  { %869 = vmatprep.subr.bf16.mxu0 %v919_v0 }
 0x204   :  { %871 = vmatpush3.bf16.msra.mxu0 %v870_v9 }
 0x205   :  { %872 = vmatprep.subr.bf16.mxu0 %v919_v0 }
 0x208   :  { %874 = vmatpush3.bf16.msra.mxu0 %v873_v12 }
 0x209   :  { %875 = vmatprep.subr.bf16.mxu0 %v919_v0 }
 0x20c   :  { %877 = vmatpush3.bf16.msra.mxu0 %v876_v15 }
 0x20d   :  { %878 = vmatprep.subr.bf16.mxu0 %v919_v0 }
 0x210   :  { %880 = vmatpush3.bf16.msra.mxu0 %v879_v18 }
 0x211   :  { %881 = vmatprep.subr.bf16.mxu0 %v919_v0 }
 0x214   :  { %883 = vmatpush3.bf16.msra.mxu0 %v882_v28 }
 0x2ca   :  { %v307_v21 = vpop.f32.mrb[2].mxu0 }
 0x2cb   :  { %v308_v22 = vadd.f32 %v307_v21, %v240_v20  ;;  %v693_v23 = vpop.f32.mrb[3].mxu0 }
 0x2cd   :  { %vm311_vm5 = vcmp.gt.f32.partialorder %v308_v22, 0.0  ;;  %v312_v24 = vmul.f32 0.2, %v308_v22 }
 0x2cf   :  { %v313_v25 = vsel %vm311_vm5, %v308_v22, %v312_v24 }
 0x2d0   :  { %727 = vmatmul.mubr.f32.vlgmr.msra.gmra.mrb[2].mxu1 %v313_v25 }
 0x3a3   :  { %v400_v0 = vpop.f32.mrb[2].mxu1 }
 0x3a4   :  { %v401_v31 = vadd.f32 %v400_v0, %v333_v30  ;;  %v728_v32 = vpop.f32.mrb[3].mxu1 }
 0x3a6   :  { %vm404_vm6 = vcmp.gt.f32.partialorder %v401_v31, 0.0  ;;  %v405_v33 = vmul.f32 0.2, %v401_v31 }
 0x3a8   :  { %v406_v34 = vsel %vm404_vm6, %v401_v31, %v405_v33 }
 0x3a9   :  { %762 = vmatmul.mubr.f32.vlgmr.msra.gmra.mrb[4].mxu0 %v406_v34 }
 0x47c   :  { %v493_v37 = vpop.f32.mrb[4].mxu0 }
 0x47d   :  { %v494_v38 = vadd.f32 %v493_v37, %v426_v36  ;;  %v763_v39 = vpop.f32.mrb[5].mxu0 }
 0x47f   :  { %v497_v40 = vadd.f32 %v494_v38, %v1006_v49 }
 0x481   :  { %498 = vst [vmem:[%s1032_s2] sm:$0xff] %v497_v40 }
 0x482   :  { %503 = vsyncpa [#allocation3], 1 }

</bundles_post_ra>
